<compile_context>
chip_gen: v7x
topology: tpu7x:2x2x1
jax: 0.10.0
libtpu: 0.0.40
codegen_flags: <defaults>
</compile_context>

<pallas_src>
import math

import jax
import jax.numpy as jnp
from jax.experimental import pallas as pl
from jax.experimental.pallas import tpu as pltpu


# Below this many bytes of edge-feature data, the pallas_call launch +
# pipeline-prime overhead dwarfs the data moved -> use a fused XLA pad instead.
_PALLAS_MIN_BYTES = 256 * 1024


# ----------------------------- Pallas kernel ------------------------------- #

def _extend_nb_kernel(x_nb_ref, out_ref):
    """Prepend a zero column to one (block_rows, d_ef) tile of x_nb.

    x_nb_ref: (TR, d_ef)    input dtype (cast happens here, in VMEM)
    out_ref:  (TR, d_ef+1)  promoted (float32) dtype
    """
    x = x_nb_ref[...].astype(out_ref.dtype)
    zero_col = jnp.zeros((x.shape[0], 1), dtype=out_ref.dtype)
    # The prepend inherently needs a lane shift; build the shifted tile once
    # and issue a single full-width store per block.
    out_ref[...] = jnp.concatenate([zero_col, x], axis=-1)


# ------------------------------- wrappers ---------------------------------- #

def _round_up(x, m):
    return ((x + m - 1) // m) * m


def _vmem_budget_bytes():
    """Generation-aware budget for the double-buffered in+out tile footprint."""
    cap = 64 << 20  # conservative default: v7x physical VMEM
    try:
        info = pltpu.get_tpu_info()
        cap = int(getattr(info, "vmem_capacity_bytes", cap))
    except Exception:
        pass
    # Stay well inside physical VMEM on every generation
    # (v7x: 64 MiB physical; v5e/v6e: 128 MiB physical, scoped default raised
    # explicitly via vmem_limit_bytes below).
    return min(cap // 2, 32 << 20)


def extend_edge_features(x_nb, *, block_rows=None, use_pallas=None):
    """(E, d_ef) -> (E, d_ef+1) with a zero column prepended (features axis)."""
    E, d_ef = x_nb.shape
    out_dtype = jnp.promote_types(x_nb.dtype, jnp.float32)  # torch.cat(zeros_f32, x)
    in_itemsize = jnp.dtype(x_nb.dtype).itemsize
    out_itemsize = jnp.dtype(out_dtype).itemsize

    if use_pallas is None:
        use_pallas = E * d_ef * in_itemsize >= _PALLAS_MIN_BYTES
    if not use_pallas:
        # Small inputs: plain XLA pad — effectively free, fuses downstream.
        return jnp.pad(x_nb.astype(out_dtype), ((0, 0), (1, 0)))

    # Row-tile granularity must respect the sublane packing of the *input*
    # dtype: f32 -> 8, bf16/fp16 -> 16, int8/fp8 -> 32.
    row_multiple = 8 * (4 // min(in_itemsize, 4))
    bytes_per_row = d_ef * in_itemsize + (d_ef + 1) * out_itemsize  # one buffer
    dbuf_bytes_per_row = 2 * bytes_per_row                          # double-buffered

    budget = _vmem_budget_bytes()
    if block_rows is None:
        block_rows = (budget // dbuf_bytes_per_row) // row_multiple * row_multiple
    block_rows = max(row_multiple, _round_up(int(block_rows), row_multiple))
    block_rows = min(block_rows, _round_up(E, row_multiple))

    # v7x megacore: if a single block would cover everything but each half is
    # still a DMA-efficient tile (>= ~1 MiB), split so grid >= 2 and both
    # TensorCores share the work.
    if pl.cdiv(E, block_rows) == 1:
        half = _round_up(pl.cdiv(_round_up(E, row_multiple), 2), row_multiple)
        if half * bytes_per_row >= (1 << 20):
            block_rows = half

    grid = (pl.cdiv(E, block_rows),)
    footprint = 2 * block_rows * bytes_per_row
    vmem_limit = int(min(2 * budget, footprint + (2 << 20)))

    # TODO(synk): the (E, d_ef+1) output is lane-sparse for small d_ef; a
    # lane-dense padded output (or picking d_ef so d_ef+1 % 128 == 0) would
    # convert masked partial stores into full-width stores if this kernel ever
    # stops being pure-DMA-bound.
    return pl.pallas_call(
        _extend_nb_kernel,
        out_shape=jax.ShapeDtypeStruct((E, d_ef + 1), out_dtype),
        grid=grid,
        in_specs=[pl.BlockSpec((block_rows, d_ef), lambda i: (i, 0))],
        out_specs=pl.BlockSpec((block_rows, d_ef + 1), lambda i: (i, 0)),
        compiler_params=pltpu.CompilerParams(
            dimension_semantics=("parallel",),   # rows shard across v7x's 2 TCs
            vmem_limit_bytes=vmem_limit),
    )(x_nb)


def central_encoder_forward(x_nb, num_nodes, *, nb_encoder, d_ef, extend=True,
                            emb_weight=None):
    """Mirrors central_encoder.forward(x_nb, num_nodes) -> (x_central, x_nb)."""
    assert x_nb.shape[1] == d_ef

    if 'one_hot_encoder' in nb_encoder:
        if extend:
            # Only real data movement in the module; auto-dispatches XLA pad
            # (small) vs. Pallas kernel (large).
            x_nb_out = extend_edge_features(x_nb)
            # x_central is input-independent (one-hot of class 0): plain XLA so
            # it fuses with downstream consumers.
            x_central = jnp.zeros((num_nodes, d_ef + 1),
                                  jnp.float32).at[:, 0].set(1.0)
            return x_central, x_nb_out
        return jnp.zeros((num_nodes, d_ef), jnp.float32), x_nb

    if extend:
        assert emb_weight is not None and emb_weight.shape == (1, d_ef)
        # x_nb passes through untouched -> no kernel, no copy.
        x_central = jnp.broadcast_to(emb_weight.astype(jnp.float32),
                                     (num_nodes, d_ef))
        return x_central, x_nb

    return jnp.zeros((num_nodes, d_ef), jnp.float32), x_nb


def make_embedding_weight(key, d_ef):
    """Deterministic xavier_uniform init for nn.Embedding(1, d_ef).weight."""
    bound = math.sqrt(6.0 / (1 + d_ef))
    return jax.random.uniform(key, (1, d_ef), jnp.float32, -bound, bound)


# --------------------------------- main ------------------------------------ #

if __name__ == "__main__":
    key = jax.random.PRNGKey(0)
    k_x, k_w, k_x2, k_x3, k_x4 = jax.random.split(key, 5)

    E = 8          # number of edges (rows of x_nb)
    d_ef = 16      # edge feature dim
    num_nodes = 6  # number of central nodes

    x_nb = jax.random.normal(k_x, (E, d_ef), dtype=jnp.float32)

    # --- branch 1: 'one_hot_encoder', extend=True (small -> fused XLA pad) ---
    x_central, x_nb_ext = central_encoder_forward(
        x_nb, num_nodes, nb_encoder='one_hot_encoder', d_ef=d_ef, extend=True)
    jax.block_until_ready((x_central, x_nb_ext))
    ref_nb = jnp.concatenate([jnp.zeros((E, 1), jnp.float32), x_nb], axis=-1)
    ref_central = jnp.zeros((num_nodes, d_ef + 1), jnp.float32).at[:, 0].set(1.0)
    assert x_nb_ext.shape == (E, d_ef + 1)
    assert x_central.shape == (num_nodes, d_ef + 1)
    assert jnp.allclose(x_nb_ext, ref_nb)
    assert jnp.allclose(x_central, ref_central)

    # --- Pallas path, multiple row blocks incl. a partial block (forced) ---
    E2 = 24
    x_nb2 = jax.random.normal(k_x2, (E2, d_ef), dtype=jnp.float32)
    x_nb2_ext = extend_edge_features(x_nb2, block_rows=8, use_pallas=True)  # grid=(3,)
    jax.block_until_ready(x_nb2_ext)
    ref_nb2 = jnp.concatenate([jnp.zeros((E2, 1), jnp.float32), x_nb2], axis=-1)
    assert jnp.allclose(x_nb2_ext, ref_nb2)

    # --- Pallas path, auto-dispatch at the size cutoff (VMEM-budgeted tile) ---
    E3 = 4096  # 4096 * 16 * 4 B = 256 KiB -> takes the Pallas path
    x_nb3 = jax.random.normal(k_x3, (E3, d_ef), dtype=jnp.float32)
    x_nb3_ext = extend_edge_features(x_nb3)
    jax.block_until_ready(x_nb3_ext)
    ref_nb3 = jnp.concatenate([jnp.zeros((E3, 1), jnp.float32), x_nb3], axis=-1)
    assert x_nb3_ext.shape == (E3, d_ef + 1)
    assert jnp.allclose(x_nb3_ext, ref_nb3)

    # --- Pallas path, bf16 input: cast happens in-kernel (in VMEM) ---
    E4 = 32
    x_nb4 = jax.random.normal(k_x4, (E4, d_ef), dtype=jnp.float32).astype(jnp.bfloat16)
    x_nb4_ext = extend_edge_features(x_nb4, use_pallas=True)
    jax.block_until_ready(x_nb4_ext)
    assert x_nb4_ext.dtype == jnp.float32
    ref_nb4 = jnp.concatenate(
        [jnp.zeros((E4, 1), jnp.float32), x_nb4.astype(jnp.float32)], axis=-1)
    assert jnp.allclose(x_nb4_ext, ref_nb4)

    # --- branch 2: 'embedding', extend=True (no kernel, no copy) ---
    w = make_embedding_weight(k_w, d_ef)
    x_central2, x_nb_out2 = central_encoder_forward(
        x_nb, num_nodes, nb_encoder='embedding', d_ef=d_ef, extend=True,
        emb_weight=w)
    jax.block_until_ready((x_central2, x_nb_out2))
    assert x_central2.shape == (num_nodes, d_ef)
    assert jnp.allclose(x_nb_out2, x_nb)
    assert jnp.allclose(x_central2, jnp.broadcast_to(w, (num_nodes, d_ef)))

    # --- branch 3: extend=False ---
    x_central3, x_nb_out3 = central_encoder_forward(
        x_nb, num_nodes, nb_encoder='one_hot_encoder', d_ef=d_ef, extend=False)
    jax.block_until_ready((x_central3, x_nb_out3))
    assert jnp.allclose(x_central3, jnp.zeros((num_nodes, d_ef)))
    assert jnp.allclose(x_nb_out3, x_nb)

    print("KERNEL_OK")
</pallas_src>

<mosaic_0001>
module attributes {stable_mosaic.version = 11 : i64} {
  func.func @_extend_nb_kernel(%arg0: i32, %arg1: memref<8x16xf32, #tpu.memory_space<vmem>>, %arg2: memref<8x17xf32, #tpu.memory_space<vmem>>) attributes {dimension_semantics = [#tpu.dimension_semantics<parallel>], iteration_bounds = array<i64: 3>, scalar_prefetch = 0 : i64, scratch_operands = 0 : i64, tpu.core_type = #tpu.core_type<tc>, window_params = [{transform_indices = @transform_0, window_bounds = array<i64: 8, 16>}, {transform_indices = @transform_1, window_bounds = array<i64: 8, 17>}]} {
    %c0 = arith.constant 0 : index
    %c0_0 = arith.constant 0 : index
    %0 = vector.load %arg1[%c0, %c0_0] : memref<8x16xf32, #tpu.memory_space<vmem>>, vector<8x16xf32>
    %cst = arith.constant 0.000000e+00 : f32
    %1 = vector.broadcast %cst : f32 to vector<8x1xf32>
    %2 = tpu.concatenate %1, %0 in 1 : vector<8x1xf32>, vector<8x16xf32> -> vector<8x17xf32>
    %c0_1 = arith.constant 0 : index
    %c0_2 = arith.constant 0 : index
    %3 = vector.load %arg2[%c0_1, %c0_2] : memref<8x17xf32, #tpu.memory_space<vmem>>, vector<8x17xf32>
    tpu.vector_store %arg2[%c0_1, %c0_2], %2 {strides = array<i32>} : memref<8x17xf32, #tpu.memory_space<vmem>>, vector<8x17xf32>,
    return
  }
  func.func @transform_0(%arg0: i32) -> (i32, i32) {
    %c0_i32 = arith.constant 0 : i32
    %c0_i32_0 = arith.constant 0 : i32
    return %arg0, %c0_i32 : i32, i32
  }
  func.func @transform_1(%arg0: i32) -> (i32, i32) {
    %c0_i32 = arith.constant 0 : i32
    %c0_i32_0 = arith.constant 0 : i32
    return %arg0, %c0_i32 : i32, i32
  }
}

</mosaic_0001>

<bundles_post_ra>
// kernel: tpu_custom_call.1
= control target key start
LH: loop header
LB: loop body
LE: loop exit
PB: predicated region body
PF: predicated region fallthrough
CT: control target
= control target key end

     0   :  { %6 = vsyncpa [#allocation3], 0  ;;  %s420_s0 = inlined_call_operand.vmem [shape: f32[24,16], index: 0, kind: input, shape index: {}]   ;;  %s421_s1 = inlined_call_operand.hbm [shape: f32[24,17], index: 1, kind: output, shape index: {}]  }
   0x1   :  { %8 = vsyncpa [#allocation3 + $0x1], 0  ;;  %s320_s6 = smov 0   ;;  %s322_s7 = smov 0  }
   0x2   :  { %s324_s8 = smov 0   ;;  %s326_s9 = smov 0  }
   0x3 LB: > { %s341_s10 = sadd.s32 4294967295, %s306_s9   ;;  %s194_s11 = sadd.s32 4294967294, %s306_s9   ;;  %s306_s9 = sphi %s326_s9, %s427_s9   ;;  %s302_s8 = sphi %s324_s8, %s426_s8   ;;  %s298_s7 = sphi %s322_s7, %s425_s7   ;;  %s294_s6 = sphi %s320_s6, %s424_s6  }
   0x4   : > { %s345_s12 = sadd.s32 1, %s306_s9   ;;  %s47_s13 = sadd.s32 1, %s302_s8 }
   0x5   : > { %s44_s14 = ssub.s32 %s306_s9, %s345_s12  ;;  %p57_p0 = scmp.ne.s32.totalorder %s302_s8, %s298_s7 }
   0x6   : > { %p45_p1 = scmp.eq.s32.totalorder %s44_s14, 0  ;;  %p58_p2 = scmp.eq.s32.totalorder %s341_s10, 2 }
   0x7   : > { %p63_p3 = scmp.ne.s32.totalorder %s298_s7, %s294_s6  ;;  %p64_p4 = scmp.eq.s32.totalorder %s194_s11, 2 }
   0x8   : > { %s356_s15 = scalar_select %p45_p1, %s302_s8, %s47_s13  }
   0x9   : > { %p358_p5 = por %p58_p2, %p57_p0  ;;  %p362_p6 = por %p64_p4, %p63_p3 }
   0xa   : > { %p197_p7 = scmp.ge.s32.totalorder %s306_s9, 1  ;;  %p89_p8 = scmp.lt.s32.totalorder %s306_s9, 4 }
   0xc   : > { %p90_p9 = pnand %p197_p7, %p89_p8 }
   0xd   : > { %p108_p10 = scmp.lt.s32.totalorder (!%p90_p9), %s341_s10, 2  ;;  %s308_s23 = smov (!%p90_p9), 1   ;;  %vm117_vm0 = vcmask (!%p90_p9), 7168   ;;  %vm119_vm1 = vcmask (!%p90_p9), 138240  }
   0xe   : > { %93 = sbr.rel (%p90_p9) target bundleno = 156 (0x9c), region = 24  ;;  %s105_s24 = sand.u32 (!%p90_p9), 1, %s298_s7  }
   0xf   : > { %s198_s25 = sshll.u32 (!%p90_p9), %s105_s24, 3  ;;  %s201_s26 = sshll.u32 (!%p90_p9), %s341_s10, 7 }
  0x10   : > { %s107_s27 = scalar_lea.vmem (!%p90_p9), [#allocation2], %s198_s25  ;;  %s378_s2 = scalar_lea.hbm (!%p90_p9), %s421_s1, %s201_s26 }
  0x11   : > { %s135_s28 = sshll.u32 (!%p90_p9), %s107_s27, 4  ;;  %s122_s3 = scalar_lea.sflag (!%p90_p9), [#allocation3], %s105_s24  ;;  %s380_s28 = int_to_ptr.vmem [resolvable:$true] %s135_s28 }
  0x12   : > { %s244_s4 = scalar_lea.vmem (!%p90_p9), %s380_s28, 128  ;;  %s309_s5 = smov (!%p90_p9), [#allocation2]  }
  0x13   : > { %p245_p11 = scmp.ne.s32.totalorder (!%p90_p9), %s380_s28, %s244_s4 }
  0x15   : > { %s109_s18 = scalar_select %p108_p10, %s341_s10, 2 }
  0x16   : > { %p246_p12 = pnand %p245_p11, %p358_p5  ;;  %s248_s10 = sshll.u32 %s309_s5, 4  ;;  %s249_s10 = int_to_ptr.vmem [resolvable:$false] %s248_s10 }
  0x17   : > { %s199_s19 = sshll.u32 %s109_s18, 3  ;;  %s250_s11 = scalar_lea.vmem %s249_s10, 256 }
  0x18   : > { %s111_s22 = scalar_lea.vmem %s420_s0, %s199_s19  ;;  %p247_p13 = pneg %p246_p12 }
  0x19   : > { %v112_v0 = vld [vmem:[%s111_s22] sm:$0xff]  ;;  %p251_p0 = scmp.lt.s32.totalorder %s380_s28, %s249_s10  ;;  %p252_p1 = scmp.lt.s32.totalorder %s250_s11, %s244_s4 }
  0x1a   : > { %114 = vrot.lane.b32.xlu0 %v112_v0, %s308_s23 }
  0x1b   : > { %p253_p2 = por %p252_p1, %p251_p0 }
  0x1d   : > { %p254_p3 = pnand %p253_p2, %p247_p13 }
  0x8c   : > { %v115_v1 = vpop.permute.xlu0 %114 }
  0x8d   : > { %v118_v2 = vsel %vm117_vm0, 0.0, %v115_v1 }
  0x8e   : > { %120 = vst.msk [vmem:[%s107_s27] sm:$0xff] %vm119_vm1, %v118_v2 }
  0x8f   : > { %257 = shalt.err (!%p254_p3)
}
  0x90   : > { %s258_s13 = scalar_lea.hbm %s378_s2, 128  ;;  %s262_s19 = scalar_lea.hbm %s421_s1, 384 }
  0x91   : > { %p259_p4 = scmp.ne.s32.totalorder %s378_s2, %s258_s13  ;;  %p263_p9 = scmp.lt.u32.totalorder %s378_s2, %s421_s1 }
  0x92   : > { %p264_p10 = scmp.lt.u32.totalorder %s262_s19, %s258_s13  ;;  %p266_p12 = scmp.lt.u32.totalorder %s258_s13, %s378_s2 }
  0x93   : > { %p260_p7 = pnand %p259_p4, %p358_p5 }
  0x94   : > { %p265_p11 = por %p264_p10, %p263_p9 }
  0x95   : > { %p261_p8 = pneg %p260_p7 }
  0x96   : > { %p267_p13 = por %p266_p12, %p265_p11 }
  0x98   : > { %p268_p0 = pnand %p267_p13, %p261_p8 }
  0x9a   : > { %271 = shalt.err (!%p268_p0)
}
  0x9b   : > { %204 = dma.vmem_to_hbm [thread:$0]  (%p358_p5), %s380_s28, 128, %s378_s2, %s122_s3  }
  0x9c PF: > { %p210_p1 = scmp.ge.s32.totalorder %s306_s9, 2  ;;  %s147_s22 = sand.u32 1, %s294_s6  }
  0x9d   : > { %s148_s23 = scalar_lea.sflag [#allocation3], %s147_s22 }
  0x9e   : > { %p207_p2 = pnand %p210_p1, %p362_p6 }
  0xa0   : > { %289 = dma.done.wait (!%p207_p2), %s148_s23, 128  }
  0xa1   : > { %291 = vsyncadd (!%p207_p2), %s148_s23, 4294967168  ;;  %p11_p3 = scmp.ge.s32.totalorder %s345_s12, 5   ;;  %s424_s6 = smov %s298_s7 }
  0xa2   : > { %s425_s7 = smov %s302_s8  ;;  %s426_s8 = smov %s356_s15 }
  0xa3   : > { %s427_s9 = smov %s345_s12  ;;  %13 = sbr.rel (!%p11_p3) target bundleno = 3 (0x3), region = 59 }
  0xaa   :  { %153 = vsyncpa [#allocation3], 1 }
  0xab   :  { %155 = vsyncpa [#allocation3 + $0x1], 1 }

</bundles_post_ra>
